<compile_context>
chip_gen: v7x
topology: tpu7x:2x2x1
jax: 0.10.0
libtpu: 0.0.40
codegen_flags: <defaults>
</compile_context>

<pallas_src>
import functools

import jax
import jax.numpy as jnp
from jax.experimental import pallas as pl
from jax.experimental.pallas import tpu as pltpu


def _round_up(x, mult):
    return ((x + mult - 1) // mult) * mult


def _largest_pow2_leq(x):
    return 1 << (max(int(x), 1).bit_length() - 1)


def _fold_lanes(x):
    """Sum a (c, t) array over lane-groups of 128 -> (c, 128).

    t is a power-of-two multiple of 128, so every halving slices whole
    128-lane vreg columns (aligned, no relayout) and the adds are pure VPU.
    """
    t = x.shape[1]
    while t > 128:
        half = t // 2
        x = x[:, :half] + x[:, half:]
        t = half
    return x


def _log_dice_partial_kernel(pred_ref, targ_ref, out_ref, acc_ref, *,
                             smooth, n_tiles, steps, rem):
    """Grid: (split, step).  Emits per-split partial sums.

    out_ref block: (1, 3, C) = [sum(p*t), sum(p^2), sum(t^2)] for this split.
    acc_ref:       (3, C, 128) lane-dense f32 accumulator (VMEM scratch).
    """
    s = pl.program_id(0)
    k = pl.program_id(1)
    tile_idx = s * steps + k

    @pl.when(k == 0)
    def _init():
        acc_ref[...] = jnp.zeros_like(acc_ref)

    def _accumulate(valid_cols):
        p = pred_ref[...].astype(jnp.float32)
        t = targ_ref[...].astype(jnp.float32)
        # torch.clamp(predict, smooth, 1 - smooth)
        p = jnp.clip(p, smooth, 1.0 - smooth)
        if valid_cols is not None:
            # Ragged tail: zero out the out-of-bounds columns (garbage data).
            col = jax.lax.broadcasted_iota(jnp.int32, p.shape, 1)
            keep = col < valid_cols
            p = jnp.where(keep, p, 0.0)
            t = jnp.where(keep, t, 0.0)
        acc_ref[0, :, :] += _fold_lanes(p * t)   # sum(predict * target, 1)
        acc_ref[1, :, :] += _fold_lanes(p * p)   # sum(predict ** 2, 1)
        acc_ref[2, :, :] += _fold_lanes(t * t)   # sum(target ** 2, 1)

    if rem == 0:
        # Every real tile is full; only skip clamped overshoot tiles.
        @pl.when(tile_idx < n_tiles)
        def _body():
            _accumulate(None)
    else:
        @pl.when(tile_idx < n_tiles - 1)
        def _full():
            _accumulate(None)

        @pl.when(tile_idx == n_tiles - 1)
        def _tail():
            _accumulate(rem)

    @pl.when(k == steps - 1)
    def _flush():
        # Single cross-lane (XLU) reduction per split, done once at the end.
        out_ref[0, 0, :] = jnp.sum(acc_ref[0, :, :], axis=1)
        out_ref[0, 1, :] = jnp.sum(acc_ref[1, :, :], axis=1)
        out_ref[0, 2, :] = jnp.sum(acc_ref[2, :, :], axis=1)


def log_dice_loss(predict, target, *, smooth=0.0001, p=2, gamma=0.3,
                  n_split=2, vmem_input_budget=16 * 1024 * 1024,
                  max_tile_m=65536):
    """Pallas implementation of logDiceloss.forward (reduction='mean')."""
    assert predict.shape[0] == target.shape[0], \
        "predict & target batch size don't match"
    assert p == 2, "only p=2 (as in the module default) is implemented"

    c = predict.shape[1]
    total = predict.size
    m = total // c

    # Matches torch `.contiguous().view(shape[1], -1)`: row-major flatten of
    # the contiguous NCHW tensor reinterpreted as (C, total // C).
    pred2 = predict.reshape(c, m)
    targ2 = target.reshape(c, m)

    # Tile size: biggest power-of-two multiple of 128 that keeps the
    # double-buffered inputs (2 arrays x 2 pipeline buffers) within the VMEM
    # budget (budget << vmem_limit_bytes below, so headroom on v5e..v7x).
    itemsize = predict.dtype.itemsize
    per_col = 2 * 2 * c * itemsize
    tile_m = min(vmem_input_budget // max(per_col, 1), max_tile_m,
                 _round_up(m, 128))
    tile_m = max(128, _largest_pow2_leq(tile_m))

    n_tiles = pl.cdiv(m, tile_m)        # total column tiles (last may be ragged)
    rem = m % tile_m                    # valid columns in the last tile (0 = full)
    n_split = max(1, min(n_split, n_tiles))
    steps = pl.cdiv(n_tiles, n_split)

    def col_block(s, k):
        # Overshoot steps of the last split are clamped onto a valid tile;
        # the kernel skips their accumulation (wasted DMA for <= 1 tile).
        return (0, jnp.minimum(s * steps + k, n_tiles - 1))

    kernel = functools.partial(
        _log_dice_partial_kernel,
        smooth=float(smooth), n_tiles=n_tiles, steps=steps, rem=rem)

    partials = pl.pallas_call(
        kernel,
        out_shape=jax.ShapeDtypeStruct((n_split, 3, c), jnp.float32),
        grid_spec=pltpu.PrefetchScalarGridSpec(
            num_scalar_prefetch=0,
            grid=(n_split, steps),
            in_specs=[
                pl.BlockSpec((c, tile_m), col_block),
                pl.BlockSpec((c, tile_m), col_block),
            ],
            out_specs=pl.BlockSpec((1, 3, c), lambda s, k: (s, 0, 0)),
            scratch_shapes=[pltpu.VMEM((3, c, 128), jnp.float32)],
        ),
        compiler_params=pltpu.CompilerParams(
            dimension_semantics=("parallel", "arbitrary"),
            vmem_limit_bytes=32 * 1024 * 1024,
        ),
    )(pred2, targ2)

    # Tiny O(C) epilogue in plain JAX; per-split partials are combined here so
    # the two-core split on v7x never shares an accumulator.
    sums = jnp.sum(partials, axis=0)                      # (3, C)
    num, den_p, den_t = sums[0], sums[1], sums[2]
    dice = (2.0 * num + smooth) / (den_p + den_t + smooth)
    log_dice = -jnp.log(dice)
    return jnp.mean(jnp.power(log_dice, gamma))


def _reference_log_dice(predict, target, smooth=0.0001, p=2, gamma=0.3):
    """Pure-JAX reference mirroring the PyTorch forward exactly."""
    c = predict.shape[1]
    pr = jnp.clip(predict, smooth, 1.0 - smooth).reshape(c, -1)
    tg = target.reshape(c, -1)
    num = jnp.sum(pr * tg, axis=1)
    den = jnp.sum(pr ** p, axis=1) + jnp.sum(tg ** p, axis=1)
    dice = (2.0 * num + smooth) / (den + smooth)
    log_dice = -jnp.log(dice)
    return jnp.mean(jnp.power(log_dice, gamma))


if __name__ == "__main__":
    key = jax.random.PRNGKey(0)
    k1, k2 = jax.random.split(key)

    N, C, H, W = 2, 4, 16, 16
    # predict: probabilities in [0, 1]; target: binary mask.
    predict = jax.random.uniform(k1, (N, C, H, W), dtype=jnp.float32)
    target = (jax.random.uniform(k2, (N, C, H, W)) > 0.5).astype(jnp.float32)

    loss = log_dice_loss(predict, target)
    loss = jax.block_until_ready(loss)

    ref = jax.block_until_ready(_reference_log_dice(predict, target))
    if not jnp.allclose(loss, ref, rtol=1e-5, atol=1e-6):
        raise AssertionError(f"mismatch: kernel={loss} ref={ref}")

    print("KERNEL_OK")
</pallas_src>

<mosaic_0001>
module attributes {stable_mosaic.version = 11 : i64} {
  func.func @_log_dice_partial_kernel(%arg0: i32, %arg1: i32, %arg2: memref<4x512xf32, #tpu.memory_space<vmem>>, %arg3: memref<4x512xf32, #tpu.memory_space<vmem>>, %arg4: memref<1x3x4xf32, #tpu.memory_space<vmem>>, %arg5: memref<3x4x128xf32, #tpu.memory_space<vmem>>) attributes {dimension_semantics = [#tpu.dimension_semantics<parallel>, #tpu.dimension_semantics<arbitrary>], iteration_bounds = array<i64: 1, 1>, scalar_prefetch = 0 : i64, scratch_operands = 1 : i64, tpu.core_type = #tpu.core_type<tc>, window_params = [{transform_indices = @transform_0, window_bounds = array<i64: 4, 512>}, {transform_indices = @transform_1, window_bounds = array<i64: 4, 512>}, {transform_indices = @transform_2, window_bounds = array<i64: 1, 3, 4>}]} {
    %c1_i32 = arith.constant 1 : i32
    %0 = arith.muli %arg0, %c1_i32 : i32
    %1 = arith.addi %0, %arg1 : i32
    %c0_i32 = arith.constant 0 : i32
    %2 = arith.cmpi eq, %arg1, %c0_i32 : i32
    %3 = arith.extui %2 : i1 to i32
    %c0_i32_0 = arith.constant 0 : i32
    %4 = arith.cmpi ne, %3, %c0_i32_0 : i32
    scf.if %4 {
      %cst = arith.constant 0.000000e+00 : f32
      %11 = vector.broadcast %cst : f32 to vector<3x4x128xf32>
      %c0 = arith.constant 0 : index
      %c0_5 = arith.constant 0 : index
      %c0_6 = arith.constant 0 : index
      %12 = vector.load %arg5[%c0, %c0_5, %c0_6] : memref<3x4x128xf32, #tpu.memory_space<vmem>>, vector<3x4x128xf32>
      tpu.vector_store %arg5[%c0, %c0_5, %c0_6], %11 {strides = array<i32>} : memref<3x4x128xf32, #tpu.memory_space<vmem>>, vector<3x4x128xf32>,
    } else {
    }
    %c1_i32_1 = arith.constant 1 : i32
    %5 = arith.cmpi slt, %1, %c1_i32_1 : i32
    %6 = arith.extui %5 : i1 to i32
    %c0_i32_2 = arith.constant 0 : i32
    %7 = arith.cmpi ne, %6, %c0_i32_2 : i32
    scf.if %7 {
      %c0 = arith.constant 0 : index
      %c0_5 = arith.constant 0 : index
      %11 = vector.load %arg2[%c0, %c0_5] : memref<4x512xf32, #tpu.memory_space<vmem>>, vector<4x512xf32>
      %c0_6 = arith.constant 0 : index
      %c0_7 = arith.constant 0 : index
      %12 = vector.load %arg3[%c0_6, %c0_7] : memref<4x512xf32, #tpu.memory_space<vmem>>, vector<4x512xf32>
      %cst = arith.constant 9.99999974E-5 : f32
      %cst_8 = arith.constant 0.999899983 : f32
      %13 = vector.broadcast %cst : f32 to vector<4x512xf32>
      %14 = arith.maximumf %13, %11 : vector<4x512xf32>
      %15 = vector.broadcast %cst_8 : f32 to vector<4x512xf32>
      %16 = arith.minimumf %15, %14 : vector<4x512xf32>
      %c0_9 = arith.constant 0 : index
      %c0_10 = arith.constant 0 : index
      %c0_11 = arith.constant 0 : index
      %17 = vector.load %arg5[%c0_9, %c0_10, %c0_11] : memref<3x4x128xf32, #tpu.memory_space<vmem>>, vector<1x4x128xf32>
      %18 = vector.shape_cast %17 : vector<1x4x128xf32> to vector<4x128xf32>
      %19 = arith.mulf %16, %12 : vector<4x512xf32>
      %20 = vector.extract_strided_slice %19 {offsets = [0, 0], sizes = [4, 256], strides = [1, 1]} : vector<4x512xf32> to vector<4x256xf32>
      %21 = vector.extract_strided_slice %19 {offsets = [0, 256], sizes = [4, 256], strides = [1, 1]} : vector<4x512xf32> to vector<4x256xf32>
      %22 = arith.addf %20, %21 : vector<4x256xf32>
      %23 = vector.extract_strided_slice %22 {offsets = [0, 0], sizes = [4, 128], strides = [1, 1]} : vector<4x256xf32> to vector<4x128xf32>
      %24 = vector.extract_strided_slice %22 {offsets = [0, 128], sizes = [4, 128], strides = [1, 1]} : vector<4x256xf32> to vector<4x128xf32>
      %25 = arith.addf %23, %24 : vector<4x128xf32>
      %26 = arith.addf %18, %25 : vector<4x128xf32>
      %c0_12 = arith.constant 0 : index
      %c0_13 = arith.constant 0 : index
      %c0_14 = arith.constant 0 : index
      %27 = vector.load %arg5[%c0_12, %c0_13, %c0_14] : memref<3x4x128xf32, #tpu.memory_space<vmem>>, vector<1x4x128xf32>
      %28 = vector.shape_cast %27 : vector<1x4x128xf32> to vector<4x128xf32>
      %29 = vector.shape_cast %26 : vector<4x128xf32> to vector<1x4x128xf32>
      tpu.vector_store %arg5[%c0_12, %c0_13, %c0_14], %29 {strides = array<i32>} : memref<3x4x128xf32, #tpu.memory_space<vmem>>, vector<1x4x128xf32>,
      %c1 = arith.constant 1 : index
      %c0_15 = arith.constant 0 : index
      %c0_16 = arith.constant 0 : index
      %30 = vector.load %arg5[%c1, %c0_15, %c0_16] : memref<3x4x128xf32, #tpu.memory_space<vmem>>, vector<1x4x128xf32>
      %31 = vector.shape_cast %30 : vector<1x4x128xf32> to vector<4x128xf32>
      %32 = arith.mulf %16, %16 : vector<4x512xf32>
      %33 = vector.extract_strided_slice %32 {offsets = [0, 0], sizes = [4, 256], strides = [1, 1]} : vector<4x512xf32> to vector<4x256xf32>
      %34 = vector.extract_strided_slice %32 {offsets = [0, 256], sizes = [4, 256], strides = [1, 1]} : vector<4x512xf32> to vector<4x256xf32>
      %35 = arith.addf %33, %34 : vector<4x256xf32>
      %36 = vector.extract_strided_slice %35 {offsets = [0, 0], sizes = [4, 128], strides = [1, 1]} : vector<4x256xf32> to vector<4x128xf32>
      %37 = vector.extract_strided_slice %35 {offsets = [0, 128], sizes = [4, 128], strides = [1, 1]} : vector<4x256xf32> to vector<4x128xf32>
      %38 = arith.addf %36, %37 : vector<4x128xf32>
      %39 = arith.addf %31, %38 : vector<4x128xf32>
      %c1_17 = arith.constant 1 : index
      %c0_18 = arith.constant 0 : index
      %c0_19 = arith.constant 0 : index
      %40 = vector.load %arg5[%c1_17, %c0_18, %c0_19] : memref<3x4x128xf32, #tpu.memory_space<vmem>>, vector<1x4x128xf32>
      %41 = vector.shape_cast %40 : vector<1x4x128xf32> to vector<4x128xf32>
      %42 = vector.shape_cast %39 : vector<4x128xf32> to vector<1x4x128xf32>
      tpu.vector_store %arg5[%c1_17, %c0_18, %c0_19], %42 {strides = array<i32>} : memref<3x4x128xf32, #tpu.memory_space<vmem>>, vector<1x4x128xf32>,
      %c2 = arith.constant 2 : index
      %c0_20 = arith.constant 0 : index
      %c0_21 = arith.constant 0 : index
      %43 = vector.load %arg5[%c2, %c0_20, %c0_21] : memref<3x4x128xf32, #tpu.memory_space<vmem>>, vector<1x4x128xf32>
      %44 = vector.shape_cast %43 : vector<1x4x128xf32> to vector<4x128xf32>
      %45 = arith.mulf %12, %12 : vector<4x512xf32>
      %46 = vector.extract_strided_slice %45 {offsets = [0, 0], sizes = [4, 256], strides = [1, 1]} : vector<4x512xf32> to vector<4x256xf32>
      %47 = vector.extract_strided_slice %45 {offsets = [0, 256], sizes = [4, 256], strides = [1, 1]} : vector<4x512xf32> to vector<4x256xf32>
      %48 = arith.addf %46, %47 : vector<4x256xf32>
      %49 = vector.extract_strided_slice %48 {offsets = [0, 0], sizes = [4, 128], strides = [1, 1]} : vector<4x256xf32> to vector<4x128xf32>
      %50 = vector.extract_strided_slice %48 {offsets = [0, 128], sizes = [4, 128], strides = [1, 1]} : vector<4x256xf32> to vector<4x128xf32>
      %51 = arith.addf %49, %50 : vector<4x128xf32>
      %52 = arith.addf %44, %51 : vector<4x128xf32>
      %c2_22 = arith.constant 2 : index
      %c0_23 = arith.constant 0 : index
      %c0_24 = arith.constant 0 : index
      %53 = vector.load %arg5[%c2_22, %c0_23, %c0_24] : memref<3x4x128xf32, #tpu.memory_space<vmem>>, vector<1x4x128xf32>
      %54 = vector.shape_cast %53 : vector<1x4x128xf32> to vector<4x128xf32>
      %55 = vector.shape_cast %52 : vector<4x128xf32> to vector<1x4x128xf32>
      tpu.vector_store %arg5[%c2_22, %c0_23, %c0_24], %55 {strides = array<i32>} : memref<3x4x128xf32, #tpu.memory_space<vmem>>, vector<1x4x128xf32>,
    } else {
    }
    %c0_i32_3 = arith.constant 0 : i32
    %8 = arith.cmpi eq, %arg1, %c0_i32_3 : i32
    %9 = arith.extui %8 : i1 to i32
    %c0_i32_4 = arith.constant 0 : i32
    %10 = arith.cmpi ne, %9, %c0_i32_4 : i32
    scf.if %10 {
      %c0 = arith.constant 0 : index
      %c0_5 = arith.constant 0 : index
      %c0_6 = arith.constant 0 : index
      %11 = vector.load %arg5[%c0, %c0_5, %c0_6] : memref<3x4x128xf32, #tpu.memory_space<vmem>>, vector<1x4x128xf32>
      %12 = vector.shape_cast %11 : vector<1x4x128xf32> to vector<4x128xf32>
      %cst = arith.constant dense<0.000000e+00> : vector<4xf32>
      %13 = vector.multi_reduction <add>, %12, %cst [1] : vector<4x128xf32> to vector<4xf32>
      %c0_7 = arith.constant 0 : index
      %c0_8 = arith.constant 0 : index
      %c0_9 = arith.constant 0 : index
      %14 = vector.load %arg4[%c0_7, %c0_8, %c0_9] : memref<1x3x4xf32, #tpu.memory_space<vmem>>, vector<1x1x4xf32>
      %15 = vector.shape_cast %14 : vector<1x1x4xf32> to vector<4xf32>
      %16 = vector.shape_cast %13 : vector<4xf32> to vector<1x1x4xf32>
      tpu.vector_store %arg4[%c0_7, %c0_8, %c0_9], %16 {strides = array<i32>} : memref<1x3x4xf32, #tpu.memory_space<vmem>>, vector<1x1x4xf32>,
      %c1 = arith.constant 1 : index
      %c0_10 = arith.constant 0 : index
      %c0_11 = arith.constant 0 : index
      %17 = vector.load %arg5[%c1, %c0_10, %c0_11] : memref<3x4x128xf32, #tpu.memory_space<vmem>>, vector<1x4x128xf32>
      %18 = vector.shape_cast %17 : vector<1x4x128xf32> to vector<4x128xf32>
      %cst_12 = arith.constant dense<0.000000e+00> : vector<4xf32>
      %19 = vector.multi_reduction <add>, %18, %cst_12 [1] : vector<4x128xf32> to vector<4xf32>
      %c0_13 = arith.constant 0 : index
      %c1_14 = arith.constant 1 : index
      %c0_15 = arith.constant 0 : index
      %20 = vector.load %arg4[%c0_13, %c1_14, %c0_15] : memref<1x3x4xf32, #tpu.memory_space<vmem>>, vector<1x1x4xf32>
      %21 = vector.shape_cast %20 : vector<1x1x4xf32> to vector<4xf32>
      %22 = vector.shape_cast %19 : vector<4xf32> to vector<1x1x4xf32>
      tpu.vector_store %arg4[%c0_13, %c1_14, %c0_15], %22 {strides = array<i32>} : memref<1x3x4xf32, #tpu.memory_space<vmem>>, vector<1x1x4xf32>,
      %c2 = arith.constant 2 : index
      %c0_16 = arith.constant 0 : index
      %c0_17 = arith.constant 0 : index
      %23 = vector.load %arg5[%c2, %c0_16, %c0_17] : memref<3x4x128xf32, #tpu.memory_space<vmem>>, vector<1x4x128xf32>
      %24 = vector.shape_cast %23 : vector<1x4x128xf32> to vector<4x128xf32>
      %cst_18 = arith.constant dense<0.000000e+00> : vector<4xf32>
      %25 = vector.multi_reduction <add>, %24, %cst_18 [1] : vector<4x128xf32> to vector<4xf32>
      %c0_19 = arith.constant 0 : index
      %c2_20 = arith.constant 2 : index
      %c0_21 = arith.constant 0 : index
      %26 = vector.load %arg4[%c0_19, %c2_20, %c0_21] : memref<1x3x4xf32, #tpu.memory_space<vmem>>, vector<1x1x4xf32>
      %27 = vector.shape_cast %26 : vector<1x1x4xf32> to vector<4xf32>
      %28 = vector.shape_cast %25 : vector<4xf32> to vector<1x1x4xf32>
      tpu.vector_store %arg4[%c0_19, %c2_20, %c0_21], %28 {strides = array<i32>} : memref<1x3x4xf32, #tpu.memory_space<vmem>>, vector<1x1x4xf32>,
    } else {
    }
    return
  }
  func.func @transform_0(%arg0: i32, %arg1: i32) -> (i32, i32) {
    %c1_i32 = arith.constant 1 : i32
    %0 = arith.muli %arg0, %c1_i32 : i32
    %1 = arith.addi %0, %arg1 : i32
    %c0_i32 = arith.constant 0 : i32
    %2 = arith.minsi %1, %c0_i32 : i32
    %c0_i32_0 = arith.constant 0 : i32
    %c0_i32_1 = arith.constant 0 : i32
    return %c0_i32_0, %2 : i32, i32
  }
  func.func @transform_1(%arg0: i32, %arg1: i32) -> (i32, i32) {
    %c1_i32 = arith.constant 1 : i32
    %0 = arith.muli %arg0, %c1_i32 : i32
    %1 = arith.addi %0, %arg1 : i32
    %c0_i32 = arith.constant 0 : i32
    %2 = arith.minsi %1, %c0_i32 : i32
    %c0_i32_0 = arith.constant 0 : i32
    %c0_i32_1 = arith.constant 0 : i32
    return %c0_i32_0, %2 : i32, i32
  }
  func.func @transform_2(%arg0: i32, %arg1: i32) -> (i32, i32, i32) {
    %c0_i32 = arith.constant 0 : i32
    %c0_i32_0 = arith.constant 0 : i32
    %c0_i32_1 = arith.constant 0 : i32
    return %arg0, %c0_i32, %c0_i32_0 : i32, i32, i32
  }
}

</mosaic_0001>

<bundles_post_ra>
// kernel: tpu_custom_call.1
= control target key start
LH: loop header
LB: loop body
LE: loop exit
PB: predicated region body
PF: predicated region fallthrough
CT: control target
= control target key end

     0   :  { %7 = vsyncpa [#allocation4], 0  ;;  %s261_s0 = inlined_call_operand.hbm [shape: f32[4,512], index: 0, kind: input, shape index: {}]   ;;  %s262_s1 = inlined_call_operand.hbm [shape: f32[4,512], index: 1, kind: input, shape index: {}]   ;;  %s263_s2 = inlined_call_operand.vmem [shape: f32[1,3,4], index: 2, kind: output, shape index: {}]  }
   0x1   :  { %8 = vsyncpa [#allocation6], 0  ;;  %s210_s9 = smov [#allocation3]   ;;  %s211_s11 = smov [#allocation5]  }
   0x2   :  { %s21_s10 = sshll.u32 %s210_s9, 4  ;;  %s37_s12 = sshll.u32 %s211_s11, 4  ;;  %s22_s10 = int_to_ptr.vmem [resolvable:$true] %s21_s10  ;;  %s38_s12 = int_to_ptr.vmem [resolvable:$true] %s37_s12 }
   0x3   :  { %s162_s15 = scalar_lea.hbm %s261_s0, 256 }
   0x4   :  { %p163_p0 = scmp.ne.s32.totalorder %s261_s0, %s162_s15  ;;  %p166_p1 = scmp.lt.u32.totalorder %s162_s15, %s261_s0 }
   0x6   :  { %p168_p2 = pnand %p166_p1, %p163_p0 }
   0x8   :  { %171 = shalt.err (!%p168_p2)
}
   0x9   :  { %s172_s20 = scalar_lea.vmem %s22_s10, 256  ;;  %p177_p4 = scmp.lt.s32.totalorder %s22_s10, %s22_s10 }
   0xa   :  { %p173_p3 = scmp.ne.s32.totalorder %s22_s10, %s172_s20  ;;  %p178_p5 = scmp.lt.s32.totalorder %s172_s20, %s172_s20 }
   0xc   :  { %p179_p6 = por %p178_p5, %p177_p4 }
   0xe   :  { %p180_p7 = pnand %p179_p6, %p173_p3 }
  0x10   :  { %183 = shalt.err (!%p180_p7)
}
  0x11   :  { %24 = dma.hbm_to_vmem [thread:$0]  %s261_s0, 256, %s22_s10, [#allocation4]  }
  0x12   :  { %s184_s25 = scalar_lea.hbm %s262_s1, 256 }
  0x13   :  { %p185_p8 = scmp.ne.s32.totalorder %s262_s1, %s184_s25  ;;  %p188_p9 = scmp.lt.u32.totalorder %s184_s25, %s262_s1 }
  0x15   :  { %p190_p10 = pnand %p188_p9, %p185_p8 }
  0x17   :  { %193 = shalt.err (!%p190_p10)
}
  0x18   :  { %s194_s30 = scalar_lea.vmem %s38_s12, 256  ;;  %p199_p12 = scmp.lt.s32.totalorder %s38_s12, %s38_s12 }
  0x19   :  { %p195_p11 = scmp.ne.s32.totalorder %s38_s12, %s194_s30  ;;  %p200_p13 = scmp.lt.s32.totalorder %s194_s30, %s194_s30 }
  0x1b   :  { %p201_p0 = por %p200_p13, %p199_p12 }
  0x1d   :  { %p202_p1 = pnand %p201_p0, %p195_p11 }
  0x1f   :  { %205 = shalt.err (!%p202_p1)
}
  0x20   :  { %40 = dma.hbm_to_vmem [thread:$0]  %s262_s1, 256, %s38_s12, [#allocation6]  }
  0x21   :  { %206 = dma.done.wait [#allocation4], 256  }
  0x22   :  { %207 = vsyncadd [#allocation4], 4294967040 }
  0x23   :  { %208 = dma.done.wait [#allocation6], 256  }
  0x24   :  { %209 = vsyncadd [#allocation6], 4294967040  ;;  %v212_v0 = vmov 0.0   ;;  %v67_v1 = vld [vmem:[#allocation3] sm:$0xff]  ;;  %v68_v2 = vld [vmem:[#allocation3 + $0x8] sm:$0xff]  ;;  %vm111_vm0 = vcmask 1043456   ;;  %v116_v36 = vlaneseq }
  0x25   :  { %60 = vst [vmem:[#allocation2] sm:$0xf] %v212_v0  ;;  %61 = vst [vmem:[#allocation2 + $0x4] sm:$0xf] %v212_v0  ;;  %v69_v3 = vld [vmem:[#allocation5] sm:$0xff]  ;;  %v70_v4 = vld [vmem:[#allocation5 + $0x8] sm:$0xff] }
  0x26   :  { %62 = vst [vmem:[#allocation2 + $0x8] sm:$0xf] %v212_v0  ;;  %v71_v5 = vmax.f32 %v67_v1, 0.0001  ;;  %v72_v6 = vmax.f32 %v68_v2, 0.0001  ;;  %v98_v7 = vmul.f32 %v69_v3, %v69_v3  ;;  %v99_v8 = vmul.f32 %v70_v4, %v70_v4 }
  0x27   :  { %v117_v37 = vand.u32 127, %v116_v36  ;;  %v119_v38 = vshrl.u32 %v116_v36, 7  ;;  %vm123_vm1 = vcmask 24576  }
  0x28   :  { %v73_v9 = vmin.f32 %v71_v5, 0.9999  ;;  %v74_v10 = vmin.f32 %v72_v6, 0.9999  ;;  %v100_v11 = vadd.f32 %v99_v8, %v98_v7 }
  0x29   :  { %v120_v39 = vsub.s32 %v117_v37, %v119_v38 }
  0x2a   :  { %v76_v12 = vmul.f32 %v73_v9, %v69_v3  ;;  %v77_v13 = vmul.f32 %v74_v10, %v70_v4  ;;  %v87_v14 = vmul.f32 %v73_v9, %v73_v9  ;;  %v88_v15 = vmul.f32 %v74_v10, %v74_v10 }
  0x2b   :  { %v102_v16 = vrot.slane %v100_v11, 4 }
  0x2c   :  { %v78_v17 = vadd.f32 %v77_v13, %v76_v12  ;;  %v89_v19 = vadd.f32 %v88_v15, %v87_v14  ;;  %v75_v23 = vld [vmem:[#allocation2] sm:$0xf]  ;;  %v86_v25 = vld [vmem:[#allocation2 + $0x4] sm:$0xf] }
  0x2d   :  { %v97_v18 = vld [vmem:[#allocation2 + $0x8] sm:$0xf]  ;;  %v104_v20 = vadd.f32 %v102_v16, %v100_v11 }
  0x2e   :  { %v80_v21 = vrot.slane %v78_v17, 4  ;;  %v91_v22 = vrot.slane %v89_v19, 4 }
  0x2f   :  { %v105_v24 = vadd.f32 %v104_v20, %v97_v18 }
  0x30   :  { %v82_v26 = vadd.f32 %v80_v21, %v78_v17  ;;  %v93_v27 = vadd.f32 %v91_v22, %v89_v19 }
  0x31   :  { %106 = vst [vmem:[#allocation2 + $0x8] sm:$0xf] %v105_v24 }
  0x32   :  { %v83_v28 = vadd.f32 %v82_v26, %v75_v23  ;;  %v94_v29 = vadd.f32 %v93_v27, %v86_v25 }
  0x34   :  { %84 = vst [vmem:[#allocation2] sm:$0xf] %v83_v28  ;;  %95 = vst [vmem:[#allocation2 + $0x4] sm:$0xf] %v94_v29 }
  0x38   :  { %v138_v30 = vld [vmem:[#allocation2 + $0x8] sm:$0xf] }
  0x39   :  { %v139_v31 = vsel %vm111_vm0, %v138_v30, 0.0 }
  0x3a   :  { %140 = vadd.xlane.f32.xlu1 %v139_v31 }
  0x3b   :  { %v110_v32 = vld [vmem:[#allocation2] sm:$0xf]  ;;  %v126_v33 = vld [vmem:[#allocation2 + $0x4] sm:$0xf] }
  0x3c   :  { %v112_v34 = vsel %vm111_vm0, %v110_v32, 0.0  ;;  %v127_v35 = vsel %vm111_vm0, %v126_v33, 0.0 }
  0x3d   :  { %113 = vadd.xlane.f32.xlu0 %v112_v34 }
  0x41   :  { %128 = vadd.xlane.f32.xlu0 %v127_v35 }
  0xc7   :  { %v141_v40 = vpop.xlane.xlu1 %140 }
  0xc8   :  { %v146_v41 = vrot.slane %v141_v40, %v120_v39 }
  0xca   :  { %v114_v42 = vpop.xlane.xlu0 %113  ;;  %148 = vst.msk [vmem:[%s263_s2 + $0x2] sm:$0x1] %vm123_vm1, %v146_v41 }
  0xcb   :  { %v121_v43 = vrot.slane %v114_v42, %v120_v39 }
  0xcd   :  { %124 = vst.msk [vmem:[%s263_s2] sm:$0x1] %vm123_vm1, %v121_v43 }
  0xce   :  { %v129_v44 = vpop.xlane.xlu0 %128 }
  0xcf   :  { %v134_v45 = vrot.slane %v129_v44, %v120_v39 }
  0xd1   :  { %136 = vst.msk [vmem:[%s263_s2 + $0x1] sm:$0x1] %vm123_vm1, %v134_v45 }
  0xd2   :  { %153 = vsyncpa [#allocation4], 1 }
  0xd3   :  { %154 = vsyncpa [#allocation6], 1 }

</bundles_post_ra>
